<compile_context>
chip_gen: v6e
topology: v6e:2x2x1
jax: 0.10.0
libtpu: 0.0.40
codegen_flags: <defaults>
</compile_context>

<pallas_src>
import functools
import math

import jax
import jax.numpy as jnp
import numpy as np
from jax.experimental import pallas as pl
from jax.experimental.pallas import tpu as pltpu

_VMEM_LIMIT = 48 * 1024 * 1024  # < 64 MiB physical VMEM on v7x, > 16/32 MiB scoped defaults


def _round_up(x, m):
    return (x + m - 1) // m * m


def _pair(v):
    return (v, v) if isinstance(v, int) else tuple(v)


# ----------------------------- Pallas kernels ----------------------------- #

def _matmul_affine_kernel(a_ref, b_ref, s_ref, t_ref, o_ref, acc_ref, *, relu):
    # (bf16 @ bf16) accumulated in f32, per-column affine (+ReLU) epilogue.
    @pl.when(pl.program_id(2) == 0)
    def _():
        acc_ref[...] = jnp.zeros_like(acc_ref)

    acc_ref[...] += jnp.dot(a_ref[...], b_ref[...],
                            preferred_element_type=jnp.float32)

    @pl.when(pl.program_id(2) == pl.num_programs(2) - 1)
    def _():
        y = acc_ref[...] * s_ref[...] + t_ref[...]
        if relu:
            y = jnp.maximum(y, 0.0)
        o_ref[...] = y.astype(o_ref.dtype)


def _avgpool3x3_kernel(x_ref, o_ref, *, H, W):
    # 3x3 stride-1 avg pool on a spatially padded (1, H+2, W+2, C) block.
    # count_include_pad=True -> fixed divisor 9; accumulate in f32.
    acc = x_ref[:, pl.ds(0, H), pl.ds(0, W), :].astype(jnp.float32)
    for i in range(3):
        for j in range(3):
            if i == 0 and j == 0:
                continue
            acc = acc + x_ref[:, pl.ds(i, H), pl.ds(j, W), :].astype(jnp.float32)
    o_ref[...] = (acc * (1.0 / 9.0)).astype(o_ref.dtype)


def _maxpool3x3s2_kernel(ee_ref, eo_ref, oe_ref, oo_ref, o_ref, *, OH, OW):
    # 3x3 stride-2 max pool expressed over the 4 even/odd row/col "quadrants"
    # so every in-kernel tap is a contiguous (non-strided) slice.
    h0, h1 = pl.ds(0, OH), pl.ds(1, OH)
    w0, w1 = pl.ds(0, OW), pl.ds(1, OW)
    r = ee_ref[:, h0, w0, :]
    r = jnp.maximum(r, ee_ref[:, h0, w1, :])
    r = jnp.maximum(r, ee_ref[:, h1, w0, :])
    r = jnp.maximum(r, ee_ref[:, h1, w1, :])
    r = jnp.maximum(r, eo_ref[:, h0, w0, :])
    r = jnp.maximum(r, eo_ref[:, h1, w0, :])
    r = jnp.maximum(r, oe_ref[:, h0, w0, :])
    r = jnp.maximum(r, oe_ref[:, h0, w1, :])
    r = jnp.maximum(r, oo_ref[:, h0, w0, :])
    o_ref[...] = r


def _spatial_mean_kernel(x_ref, o_ref, *, hw):
    o_ref[...] = (jnp.sum(x_ref[...].astype(jnp.float32), axis=1, keepdims=True)
                  * (1.0 / hw)).astype(o_ref.dtype)


# -------------------------- jitted pallas_call wrappers -------------------- #

@functools.partial(jax.jit, static_argnames=("relu", "out_dtype", "tm", "tk", "tn"))
def _matmul_affine_call(a_p, b_p, s_p, t_p, relu, out_dtype, tm, tk, tn):
    Mp, Kp = a_p.shape
    Np = b_p.shape[1]
    return pl.pallas_call(
        functools.partial(_matmul_affine_kernel, relu=relu),
        out_shape=jax.ShapeDtypeStruct((Mp, Np), out_dtype),
        grid=(Mp // tm, Np // tn, Kp // tk),
        in_specs=[
            pl.BlockSpec((tm, tk), lambda i, j, k: (i, k)),
            pl.BlockSpec((tk, tn), lambda i, j, k: (k, j)),
            pl.BlockSpec((1, tn), lambda i, j, k: (0, j)),
            pl.BlockSpec((1, tn), lambda i, j, k: (0, j)),
        ],
        out_specs=pl.BlockSpec((tm, tn), lambda i, j, k: (i, j)),
        scratch_shapes=[pltpu.VMEM((tm, tn), jnp.float32)],
        compiler_params=pltpu.CompilerParams(
            dimension_semantics=("parallel", "parallel", "arbitrary"),
            vmem_limit_bytes=_VMEM_LIMIT),
    )(a_p, b_p, s_p, t_p)


@functools.partial(jax.jit, static_argnames=("H", "W"))
def _avgpool_call(xp, H, W):
    N, Hp2, Wp2, C = xp.shape
    return pl.pallas_call(
        functools.partial(_avgpool3x3_kernel, H=H, W=W),
        out_shape=jax.ShapeDtypeStruct((N, H, W, C), xp.dtype),
        grid=(N,),
        in_specs=[pl.BlockSpec((1, Hp2, Wp2, C), lambda n: (n, 0, 0, 0))],
        out_specs=pl.BlockSpec((1, H, W, C), lambda n: (n, 0, 0, 0)),
        compiler_params=pltpu.CompilerParams(
            dimension_semantics=("parallel",),
            vmem_limit_bytes=_VMEM_LIMIT),
    )(xp)


@functools.partial(jax.jit, static_argnames=("OH", "OW"))
def _maxpool_call(ee, eo, oe, oo, OH, OW):
    N, He, We, C = ee.shape
    Wo = eo.shape[2]
    Ho = oe.shape[1]
    return pl.pallas_call(
        functools.partial(_maxpool3x3s2_kernel, OH=OH, OW=OW),
        out_shape=jax.ShapeDtypeStruct((N, OH, OW, C), ee.dtype),
        grid=(N,),
        in_specs=[
            pl.BlockSpec((1, He, We, C), lambda n: (n, 0, 0, 0)),
            pl.BlockSpec((1, He, Wo, C), lambda n: (n, 0, 0, 0)),
            pl.BlockSpec((1, Ho, We, C), lambda n: (n, 0, 0, 0)),
            pl.BlockSpec((1, Ho, Wo, C), lambda n: (n, 0, 0, 0)),
        ],
        out_specs=pl.BlockSpec((1, OH, OW, C), lambda n: (n, 0, 0, 0)),
        compiler_params=pltpu.CompilerParams(
            dimension_semantics=("parallel",),
            vmem_limit_bytes=_VMEM_LIMIT),
    )(ee, eo, oe, oo)


@functools.partial(jax.jit, static_argnames=("hw",))
def _spatial_mean_call(x_p, hw):
    N, hw_p, Cp = x_p.shape
    return pl.pallas_call(
        functools.partial(_spatial_mean_kernel, hw=hw),
        out_shape=jax.ShapeDtypeStruct((N, 1, Cp), jnp.float32),
        grid=(N, Cp // 128),
        in_specs=[pl.BlockSpec((1, hw_p, 128), lambda n, j: (n, 0, j))],
        out_specs=pl.BlockSpec((1, 1, 128), lambda n, j: (n, 0, j)),
        compiler_params=pltpu.CompilerParams(
            dimension_semantics=("parallel", "parallel"),
            vmem_limit_bytes=_VMEM_LIMIT),
    )(x_p)


# ------------------------------- op wrappers ------------------------------- #

def _choose_tiles(M, K, N):
    """Adaptive tile sizes: single lane/sublane-dense blocks for small dims,
    512x256 tiles for large dims, K never padded up to 128 when it is small."""
    # M (rows)
    if M <= 2560:
        Mp = _round_up(M, 16)
        tm = Mp
    else:
        tm = 512
        Mp = _round_up(M, tm)
    # K (reduction)
    if K <= 128:
        Kp = _round_up(K, 16)
        tk = Kp
    elif K <= 2048:
        Kp = _round_up(K, 128)
        tk = Kp
    else:
        tk = 256
        Kp = _round_up(K, tk)
    # N (cols)
    if N <= 512:
        Np = _round_up(N, 128)
        tn = Np
    else:
        tn = 256
        Np = _round_up(N, tn)
    return Mp, Kp, Np, tm, tk, tn


def _pad2(x, r, c):
    pr, pc = r - x.shape[0], c - x.shape[1]
    if pr == 0 and pc == 0:
        return x
    return jnp.pad(x, ((0, pr), (0, pc)))


def matmul_affine(a, b, scale, shift, relu, out_dtype=jnp.float32):
    """out = relu_opt((a @ b) * scale + shift), scale/shift broadcast over rows.
    Operands are cast to bf16, accumulation is f32."""
    M, K = a.shape
    N = b.shape[1]
    Mp, Kp, Np, tm, tk, tn = _choose_tiles(M, K, N)
    a_p = _pad2(a.astype(jnp.bfloat16), Mp, Kp)
    b_p = _pad2(b.astype(jnp.bfloat16), Kp, Np)
    s_p = _pad2(scale.astype(jnp.float32).reshape(1, N), 1, Np)
    t_p = _pad2(shift.astype(jnp.float32).reshape(1, N), 1, Np)
    out = _matmul_affine_call(a_p, b_p, s_p, t_p, relu, out_dtype, tm, tk, tn)
    if Mp != M or Np != N:
        out = out[:M, :N]
    return out


def _bilinear_matrix(src, dst):
    if src == 1:
        return jnp.ones((dst, 1), jnp.float32)
    pos = np.arange(dst, dtype=np.float64) * (src - 1) / (dst - 1)
    lo = np.clip(np.floor(pos).astype(np.int64), 0, src - 2)
    frac = (pos - lo).astype(np.float32)
    R = np.zeros((dst, src), dtype=np.float32)
    R[np.arange(dst), lo] = 1.0 - frac
    R[np.arange(dst), lo + 1] = frac
    return jnp.asarray(R)


def bilinear_resize_299(x):
    # F.interpolate(..., size=(299,299), mode='bilinear', align_corners=True)
    # done as two separable Pallas matmuls.  x: (N, C, H, W) -> (N, C, 299, 299)
    N, C, H, W = x.shape
    Rw = _bilinear_matrix(W, 299)
    Rh = _bilinear_matrix(H, 299)
    ones = jnp.ones((299,), jnp.float32)
    zeros = jnp.zeros((299,), jnp.float32)
    y = matmul_affine(x.reshape(N * C * H, W), Rw.T, ones, zeros, relu=False,
                      out_dtype=jnp.bfloat16)
    y = y.reshape(N * C, H, 299).transpose(0, 2, 1).reshape(N * C * 299, H)
    z = matmul_affine(y, Rh.T, ones, zeros, relu=False, out_dtype=jnp.bfloat16)
    z = z.reshape(N * C, 299, 299).transpose(0, 2, 1)
    return z.reshape(N, C, 299, 299)


def max_pool_3x3_s2(x):
    # F.max_pool2d(x, kernel_size=3, stride=2), no padding, floor mode.  x: NHWC
    N, H, W, C = x.shape
    OH, OW = (H - 3) // 2 + 1, (W - 3) // 2 + 1
    # Even/odd row/col quadrants -> every 3x3 stride-2 tap becomes a contiguous slice.
    xee = x[:, 0::2, 0::2, :]
    xeo = x[:, 0::2, 1::2, :]
    xoe = x[:, 1::2, 0::2, :]
    xoo = x[:, 1::2, 1::2, :]
    return _maxpool_call(xee, xeo, xoe, xoo, OH, OW)


def avg_pool_3x3_s1_p1(x):
    # F.avg_pool2d(x, 3, stride=1, padding=1) with count_include_pad=True.  x: NHWC
    N, H, W, C = x.shape
    xp = jnp.pad(x, ((0, 0), (1, 1), (1, 1), (0, 0)))
    return _avgpool_call(xp, H, W)


def spatial_mean(x):
    # torch.mean(x.view(N, C, -1), 2) on NHWC features -> (N, C), f32 output
    N, H, W, C = x.shape
    hw = H * W
    hw_p, Cp = _round_up(hw, 16), _round_up(C, 128)
    xr = x.reshape(N, hw, C)
    if hw_p != hw or Cp != C:
        xr = jnp.pad(xr, ((0, 0), (0, hw_p - hw), (0, Cp - C)))
    out = _spatial_mean_call(xr, hw).reshape(N, Cp)
    if Cp != C:
        out = out[:, :C]
    return out


# ------------------------- BasicConv2d (conv+BN+ReLU) ----------------------- #

def _im2col(x, kh, kw, sh, sw, ph, pw):
    N, H, W, C = x.shape
    if ph or pw:
        x = jnp.pad(x, ((0, 0), (ph, ph), (pw, pw), (0, 0)))
    Hp, Wp = H + 2 * ph, W + 2 * pw
    OH, OW = (Hp - kh) // sh + 1, (Wp - kw) // sw + 1
    cols = [x[:, i:i + sh * (OH - 1) + 1:sh, j:j + sw * (OW - 1) + 1:sw, :]
            for i in range(kh) for j in range(kw)]
    patches = jnp.stack(cols, axis=3)                 # (N, OH, OW, kh*kw, C)
    return patches.reshape(N * OH * OW, kh * kw * C), (N, OH, OW)


def basic_conv2d(x, p):
    # conv (no bias) + folded BatchNorm affine + ReLU, all fused in the matmul kernel
    kh, kw, sh, sw, ph, pw = p["kh"], p["kw"], p["sh"], p["sw"], p["ph"], p["pw"]
    N, H, W, C = x.shape
    if kh == 1 and kw == 1 and sh == 1 and sw == 1 and ph == 0 and pw == 0:
        patches = x.reshape(N * H * W, C)             # 1x1 conv: no patch gather
        OH, OW = H, W
    else:
        patches, (N, OH, OW) = _im2col(x, kh, kw, sh, sw, ph, pw)
    y = matmul_affine(patches, p["w2d"], p["scale"], p["shift"], relu=True,
                      out_dtype=jnp.bfloat16)
    return y.reshape(N, OH, OW, p["cout"])


def bconv_params(key, cin, cout, ksize, stride=1, padding=0):
    kh, kw = _pair(ksize)
    sh, sw = _pair(stride)
    ph, pw = _pair(padding)
    k1, k2, k3 = jax.random.split(key, 3)
    fan_in = cin * kh * kw
    w = jax.random.normal(k1, (kh, kw, cin, cout), jnp.float32) * np.float32(
        1.0 / math.sqrt(fan_in))
    scale = 1.0 + 0.05 * jax.random.normal(k2, (cout,), jnp.float32)
    shift = 0.05 * jax.random.normal(k3, (cout,), jnp.float32)
    return dict(w2d=w.reshape(kh * kw * cin, cout).astype(jnp.bfloat16),
                scale=scale, shift=shift, kh=kh, kw=kw, sh=sh, sw=sw,
                ph=ph, pw=pw, cin=cin, cout=cout)


def _fold_normalization(p1, mean, std):
    # (x - mean)/std is per-channel affine and commutes with the linear resize,
    # so it folds exactly into the first conv:  w' = w/std,  shift' = shift - scale*const
    kh, kw, cin, cout = p1["kh"], p1["kw"], p1["cin"], p1["cout"]
    w4 = p1["w2d"].astype(jnp.float32).reshape(kh, kw, cin, cout)
    inv_std = (1.0 / std).reshape(1, 1, cin, 1)
    w4f = w4 * inv_std
    const = jnp.sum(w4 * (mean.reshape(1, 1, cin, 1) * inv_std), axis=(0, 1, 2))
    q = dict(p1)
    q["w2d"] = w4f.reshape(kh * kw * cin, cout).astype(jnp.bfloat16)
    q["shift"] = p1["shift"] - p1["scale"] * const
    return q


# ---------------------------- Inception blocks ------------------------------ #

def inception_a_params(key, cin, pool_features):
    k = jax.random.split(key, 7)
    return dict(
        b1=bconv_params(k[0], cin, 64, 1),
        b5_1=bconv_params(k[1], cin, 48, 1),
        b5_2=bconv_params(k[2], 48, 64, 5, padding=2),
        b3_1=bconv_params(k[3], cin, 64, 1),
        b3_2=bconv_params(k[4], 64, 96, 3, padding=1),
        b3_3=bconv_params(k[5], 96, 96, 3, padding=1),
        bp=bconv_params(k[6], cin, pool_features, 1),
    )


def inception_a(x, p):
    b1 = basic_conv2d(x, p["b1"])
    b5 = basic_conv2d(basic_conv2d(x, p["b5_1"]), p["b5_2"])
    b3 = basic_conv2d(basic_conv2d(basic_conv2d(x, p["b3_1"]), p["b3_2"]), p["b3_3"])
    bp = basic_conv2d(avg_pool_3x3_s1_p1(x), p["bp"])
    return jnp.concatenate([b1, b5, b3, bp], axis=-1)


def inception_b_params(key, cin):
    k = jax.random.split(key, 4)
    return dict(
        b3=bconv_params(k[0], cin, 384, 3, stride=2),
        bd1=bconv_params(k[1], cin, 64, 1),
        bd2=bconv_params(k[2], 64, 96, 3, padding=1),
        bd3=bconv_params(k[3], 96, 96, 3, stride=2),
    )


def inception_b(x, p):
    b3 = basic_conv2d(x, p["b3"])
    bd = basic_conv2d(basic_conv2d(basic_conv2d(x, p["bd1"]), p["bd2"]), p["bd3"])
    bp = max_pool_3x3_s2(x)
    return jnp.concatenate([b3, bd, bp], axis=-1)


def inception_c_params(key, cin, c7):
    k = jax.random.split(key, 10)
    return dict(
        b1=bconv_params(k[0], cin, 192, 1),
        b7_1=bconv_params(k[1], cin, c7, 1),
        b7_2=bconv_params(k[2], c7, c7, (1, 7), padding=(0, 3)),
        b7_3=bconv_params(k[3], c7, 192, (7, 1), padding=(3, 0)),
        bd_1=bconv_params(k[4], cin, c7, 1),
        bd_2=bconv_params(k[5], c7, c7, (7, 1), padding=(3, 0)),
        bd_3=bconv_params(k[6], c7, c7, (1, 7), padding=(0, 3)),
        bd_4=bconv_params(k[7], c7, c7, (7, 1), padding=(3, 0)),
        bd_5=bconv_params(k[8], c7, 192, (1, 7), padding=(0, 3)),
        bp=bconv_params(k[9], cin, 192, 1),
    )


def inception_c(x, p):
    b1 = basic_conv2d(x, p["b1"])
    b7 = basic_conv2d(basic_conv2d(basic_conv2d(x, p["b7_1"]), p["b7_2"]), p["b7_3"])
    bd = x
    for name in ("bd_1", "bd_2", "bd_3", "bd_4", "bd_5"):
        bd = basic_conv2d(bd, p[name])
    bp = basic_conv2d(avg_pool_3x3_s1_p1(x), p["bp"])
    return jnp.concatenate([b1, b7, bd, bp], axis=-1)


def inception_d_params(key, cin):
    k = jax.random.split(key, 6)
    return dict(
        b3_1=bconv_params(k[0], cin, 192, 1),
        b3_2=bconv_params(k[1], 192, 320, 3, stride=2),
        b7_1=bconv_params(k[2], cin, 192, 1),
        b7_2=bconv_params(k[3], 192, 192, (1, 7), padding=(0, 3)),
        b7_3=bconv_params(k[4], 192, 192, (7, 1), padding=(3, 0)),
        b7_4=bconv_params(k[5], 192, 192, 3, stride=2),
    )


def inception_d(x, p):
    b3 = basic_conv2d(basic_conv2d(x, p["b3_1"]), p["b3_2"])
    b7 = x
    for name in ("b7_1", "b7_2", "b7_3", "b7_4"):
        b7 = basic_conv2d(b7, p[name])
    bp = max_pool_3x3_s2(x)
    return jnp.concatenate([b3, b7, bp], axis=-1)


def inception_e_params(key, cin):
    k = jax.random.split(key, 9)
    return dict(
        b1=bconv_params(k[0], cin, 320, 1),
        b3_1=bconv_params(k[1], cin, 384, 1),
        b3_2a=bconv_params(k[2], 384, 384, (1, 3), padding=(0, 1)),
        b3_2b=bconv_params(k[3], 384, 384, (3, 1), padding=(1, 0)),
        bd_1=bconv_params(k[4], cin, 448, 1),
        bd_2=bconv_params(k[5], 448, 384, 3, padding=1),
        bd_3a=bconv_params(k[6], 384, 384, (1, 3), padding=(0, 1)),
        bd_3b=bconv_params(k[7], 384, 384, (3, 1), padding=(1, 0)),
        bp=bconv_params(k[8], cin, 192, 1),
    )


def inception_e(x, p):
    b1 = basic_conv2d(x, p["b1"])
    t = basic_conv2d(x, p["b3_1"])
    b3 = jnp.concatenate([basic_conv2d(t, p["b3_2a"]),
                          basic_conv2d(t, p["b3_2b"])], axis=-1)
    t = basic_conv2d(basic_conv2d(x, p["bd_1"]), p["bd_2"])
    bd = jnp.concatenate([basic_conv2d(t, p["bd_3a"]),
                          basic_conv2d(t, p["bd_3b"])], axis=-1)
    bp = basic_conv2d(avg_pool_3x3_s1_p1(x), p["bp"])
    return jnp.concatenate([b1, b3, bd, bp], axis=-1)


# ------------------------------ WrapInception ------------------------------- #

def init_wrap_inception_params(key):
    k = jax.random.split(key, 18)
    p = {
        "Conv2d_1a_3x3": bconv_params(k[0], 3, 32, 3, stride=2),
        "Conv2d_2a_3x3": bconv_params(k[1], 32, 32, 3),
        "Conv2d_2b_3x3": bconv_params(k[2], 32, 64, 3, padding=1),
        "Conv2d_3b_1x1": bconv_params(k[3], 64, 80, 1),
        "Conv2d_4a_3x3": bconv_params(k[4], 80, 192, 3),
        "Mixed_5b": inception_a_params(k[5], 192, 32),
        "Mixed_5c": inception_a_params(k[6], 256, 64),
        "Mixed_5d": inception_a_params(k[7], 288, 64),
        "Mixed_6a": inception_b_params(k[8], 288),
        "Mixed_6b": inception_c_params(k[9], 768, 128),
        "Mixed_6c": inception_c_params(k[10], 768, 160),
        "Mixed_6d": inception_c_params(k[11], 768, 160),
        "Mixed_6e": inception_c_params(k[12], 768, 192),
        "Mixed_7a": inception_d_params(k[13], 768),
        "Mixed_7b": inception_e_params(k[14], 1280),
        "Mixed_7c": inception_e_params(k[15], 2048),
    }
    p["fc_w"] = (jax.random.normal(k[16], (2048, 1000), jnp.float32)
                 * np.float32(1.0 / math.sqrt(2048))).astype(jnp.bfloat16)
    p["fc_b"] = 0.01 * jax.random.normal(k[17], (1000,), jnp.float32)
    p["mean"] = jnp.array([0.485, 0.456, 0.406], jnp.float32)
    p["std"] = jnp.array([0.229, 0.224, 0.225], jnp.float32)
    return p


def wrap_inception_forward(x, p):
    """x: (N, 3, H, W) float32 (NCHW).  Returns (pool (N,2048), logits (N,1000))."""
    # (x-mean)/std is folded into Conv2d_1a (it commutes with the bilinear resize),
    # so the raw image goes straight into the resize / first conv.
    x = x.astype(jnp.bfloat16)
    if x.shape[2] != 299 or x.shape[3] != 299:
        x = bilinear_resize_299(x)
    x = jnp.transpose(x, (0, 2, 3, 1))              # -> NHWC for the conv pipeline
    stem1 = _fold_normalization(p["Conv2d_1a_3x3"], p["mean"], p["std"])
    x = basic_conv2d(x, stem1)                      # 149x149x32
    x = basic_conv2d(x, p["Conv2d_2a_3x3"])         # 147x147x32
    x = basic_conv2d(x, p["Conv2d_2b_3x3"])         # 147x147x64
    x = max_pool_3x3_s2(x)                          # 73x73x64
    x = basic_conv2d(x, p["Conv2d_3b_1x1"])         # 73x73x80
    x = basic_conv2d(x, p["Conv2d_4a_3x3"])         # 71x71x192
    x = max_pool_3x3_s2(x)                          # 35x35x192
    x = inception_a(x, p["Mixed_5b"])               # 35x35x256
    x = inception_a(x, p["Mixed_5c"])               # 35x35x288
    x = inception_a(x, p["Mixed_5d"])               # 35x35x288
    x = inception_b(x, p["Mixed_6a"])               # 17x17x768
    x = inception_c(x, p["Mixed_6b"])               # 17x17x768
    x = inception_c(x, p["Mixed_6c"])               # 17x17x768
    x = inception_c(x, p["Mixed_6d"])               # 17x17x768
    x = inception_c(x, p["Mixed_6e"])               # 17x17x768
    x = inception_d(x, p["Mixed_7a"])               # 8x8x1280
    x = inception_e(x, p["Mixed_7b"])               # 8x8x2048
    x = inception_e(x, p["Mixed_7c"])               # 8x8x2048
    pool = spatial_mean(x)                          # (N, 2048) float32
    # F.dropout(pool, training=False) is the identity.
    logits = matmul_affine(pool, p["fc_w"], jnp.ones((1000,), jnp.float32),
                           p["fc_b"], relu=False, out_dtype=jnp.float32)
    return pool, logits


if __name__ == "__main__":
    key = jax.random.PRNGKey(0)
    kx, kp = jax.random.split(key)
    x = jax.random.uniform(kx, (2, 3, 16, 16), dtype=jnp.float32)  # NCHW input
    params = init_wrap_inception_params(kp)
    pool, logits = wrap_inception_forward(x, params)
    jax.block_until_ready((pool, logits))
    assert pool.shape == (2, 2048), pool.shape
    assert logits.shape == (2, 1000), logits.shape
    assert bool(jnp.all(jnp.isfinite(pool))) and bool(jnp.all(jnp.isfinite(logits)))
    print("KERNEL_OK")
</pallas_src>

<mosaic_0001>
module attributes {stable_mosaic.version = 11 : i64} {
  func.func @_matmul_affine_kernel(%arg0: i32, %arg1: i32, %arg2: i32, %arg3: memref<96x16xbf16, #tpu.memory_space<vmem>>, %arg4: memref<16x384xbf16, #tpu.memory_space<vmem>>, %arg5: memref<1x384xf32, #tpu.memory_space<vmem>>, %arg6: memref<1x384xf32, #tpu.memory_space<vmem>>, %arg7: memref<96x384xbf16, #tpu.memory_space<vmem>>, %arg8: memref<96x384xf32, #tpu.memory_space<vmem>>) attributes {dimension_semantics = [#tpu.dimension_semantics<parallel>, #tpu.dimension_semantics<parallel>, #tpu.dimension_semantics<arbitrary>], iteration_bounds = array<i64: 1, 1, 1>, scalar_prefetch = 0 : i64, scratch_operands = 1 : i64, tpu.core_type = #tpu.core_type<tc>, window_params = [{transform_indices = @transform_0, window_bounds = array<i64: 96, 16>}, {transform_indices = @transform_1, window_bounds = array<i64: 16, 384>}, {transform_indices = @transform_2, window_bounds = array<i64: 1, 384>}, {transform_indices = @transform_3, window_bounds = array<i64: 1, 384>}, {transform_indices = @transform_4, window_bounds = array<i64: 96, 384>}]} {
    %c0_i32 = arith.constant 0 : i32
    %0 = arith.cmpi eq, %arg2, %c0_i32 : i32
    %1 = arith.extui %0 : i1 to i32
    %c0_i32_0 = arith.constant 0 : i32
    %2 = arith.cmpi ne, %1, %c0_i32_0 : i32
    scf.if %2 {
      %cst_10 = arith.constant 0.000000e+00 : f32
      %12 = vector.broadcast %cst_10 : f32 to vector<96x384xf32>
      %c0_11 = arith.constant 0 : index
      %c0_12 = arith.constant 0 : index
      %13 = vector.load %arg8[%c0_11, %c0_12] : memref<96x384xf32, #tpu.memory_space<vmem>>, vector<96x384xf32>
      tpu.vector_store %arg8[%c0_11, %c0_12], %12 {strides = array<i32>} : memref<96x384xf32, #tpu.memory_space<vmem>>, vector<96x384xf32>,
    } else {
    }
    %c0 = arith.constant 0 : index
    %c0_1 = arith.constant 0 : index
    %3 = vector.load %arg8[%c0, %c0_1] : memref<96x384xf32, #tpu.memory_space<vmem>>, vector<96x384xf32>
    %c0_2 = arith.constant 0 : index
    %c0_3 = arith.constant 0 : index
    %4 = vector.load %arg3[%c0_2, %c0_3] : memref<96x16xbf16, #tpu.memory_space<vmem>>, vector<96x16xbf16>
    %c0_4 = arith.constant 0 : index
    %c0_5 = arith.constant 0 : index
    %5 = vector.load %arg4[%c0_4, %c0_5] : memref<16x384xbf16, #tpu.memory_space<vmem>>, vector<16x384xbf16>
    %cst = arith.constant dense<0.000000e+00> : vector<96x384xf32>
    %6 = tpu.matmul %4, %5, %cst {dimension_numbers = #tpu.dot_dimension_numbers<[1], [0], [0], [1], [0, 0, 1, 1], [], []>} : vector<96x16xbf16>, vector<16x384xbf16>, vector<96x384xf32> -> vector<96x384xf32>
    %7 = arith.addf %3, %6 : vector<96x384xf32>
    %c0_6 = arith.constant 0 : index
    %c0_7 = arith.constant 0 : index
    %8 = vector.load %arg8[%c0_6, %c0_7] : memref<96x384xf32, #tpu.memory_space<vmem>>, vector<96x384xf32>
    tpu.vector_store %arg8[%c0_6, %c0_7], %7 {strides = array<i32>} : memref<96x384xf32, #tpu.memory_space<vmem>>, vector<96x384xf32>,
    %c0_i32_8 = arith.constant 0 : i32
    %9 = arith.cmpi eq, %arg2, %c0_i32_8 : i32
    %10 = arith.extui %9 : i1 to i32
    %c0_i32_9 = arith.constant 0 : i32
    %11 = arith.cmpi ne, %10, %c0_i32_9 : i32
    scf.if %11 {
      %c0_10 = arith.constant 0 : index
      %c0_11 = arith.constant 0 : index
      %12 = vector.load %arg8[%c0_10, %c0_11] : memref<96x384xf32, #tpu.memory_space<vmem>>, vector<96x384xf32>
      %c0_12 = arith.constant 0 : index
      %c0_13 = arith.constant 0 : index
      %13 = vector.load %arg5[%c0_12, %c0_13] : memref<1x384xf32, #tpu.memory_space<vmem>>, vector<1x384xf32>
      %14 = vector.broadcast %13 : vector<1x384xf32> to vector<96x384xf32>
      %15 = arith.mulf %12, %14 : vector<96x384xf32>
      %c0_14 = arith.constant 0 : index
      %c0_15 = arith.constant 0 : index
      %16 = vector.load %arg6[%c0_14, %c0_15] : memref<1x384xf32, #tpu.memory_space<vmem>>, vector<1x384xf32>
      %17 = vector.broadcast %16 : vector<1x384xf32> to vector<96x384xf32>
      %18 = arith.addf %15, %17 : vector<96x384xf32>
      %19 = arith.truncf %18 : vector<96x384xf32> to vector<96x384xbf16>
      %c0_16 = arith.constant 0 : index
      %c0_17 = arith.constant 0 : index
      %20 = vector.load %arg7[%c0_16, %c0_17] : memref<96x384xbf16, #tpu.memory_space<vmem>>, vector<96x384xbf16>
      tpu.vector_store %arg7[%c0_16, %c0_17], %19 {strides = array<i32>} : memref<96x384xbf16, #tpu.memory_space<vmem>>, vector<96x384xbf16>,
    } else {
    }
    return
  }
  func.func @transform_0(%arg0: i32, %arg1: i32, %arg2: i32) -> (i32, i32) {
    %c0_i32 = arith.constant 0 : i32
    return %arg0, %arg2 : i32, i32
  }
  func.func @transform_1(%arg0: i32, %arg1: i32, %arg2: i32) -> (i32, i32) {
    %c0_i32 = arith.constant 0 : i32
    return %arg2, %arg1 : i32, i32
  }
  func.func @transform_2(%arg0: i32, %arg1: i32, %arg2: i32) -> (i32, i32) {
    %c0_i32 = arith.constant 0 : i32
    %c0_i32_0 = arith.constant 0 : i32
    return %c0_i32, %arg1 : i32, i32
  }
  func.func @transform_3(%arg0: i32, %arg1: i32, %arg2: i32) -> (i32, i32) {
    %c0_i32 = arith.constant 0 : i32
    %c0_i32_0 = arith.constant 0 : i32
    return %c0_i32, %arg1 : i32, i32
  }
  func.func @transform_4(%arg0: i32, %arg1: i32, %arg2: i32) -> (i32, i32) {
    %c0_i32 = arith.constant 0 : i32
    return %arg0, %arg1 : i32, i32
  }
}

</mosaic_0001>

<bundles_post_ra>
// kernel: _matmul_affine_call.1
= control target key start
LH: loop header
LB: loop body
LE: loop exit
PB: predicated region body
PF: predicated region fallthrough
CT: control target
= control target key end

     0   :  { %v855_v2 = vmov 0   ;;  %vm157_vm0 = vcmask 130048   ;;  %s1016_s0 = inlined_call_operand.vmem [shape: bf16[96,16], index: 0, kind: input, shape index: {}]   ;;  %s1017_s1 = inlined_call_operand.vmem [shape: bf16[16,384], index: 1, kind: input, shape index: {}]   ;;  %s1018_s2 = inlined_call_operand.vmem [shape: f32[1,384], index: 2, kind: input, shape index: {}]   ;;  %s1019_s3 = inlined_call_operand.vmem [shape: f32[1,384], index: 3, kind: input, shape index: {}]   ;;  %s1020_s4 = inlined_call_operand.hbm [shape: bf16[96,384], index: 4, kind: output, shape index: {}]  }
   0x1   :  { %v823_v0 = vld [vmem:[%s1017_s1 + $0x4] ss:$12 sps:$4 sm:$0xff]   ;;  %v825_v1 = vld [vmem:[%s1017_s1] ss:$12 sps:$4 sm:$0xff]   ;;  %208 = vmatprep.mubr.bf16.mxu0 %v855_v2  ;;  %258 = vmatprep.mubr.bf16.mxu1 %v855_v2  ;;  %v828_v5 = vld [vmem:[%s1017_s1 + $0x8] ss:$12 sps:$4 sm:$0xff]  }
   0x2   :  { %190 = vmatprep.subr.bf16.mxu0 %v823_v0  ;;  %817 = vmatprep.subr.bf16.mxu1 %v823_v0  ;;  %v826_v3 = vld [vmem:[%s1016_s0] sm:$0xff]   ;;  %v827_v4 = vld [vmem:[%s1016_s0 + $0x28] sm:$0xff]  }
   0x3   :  { %191 = vmatpush1.bf16.msra.mxu0 %v825_v1  ;;  %818 = vmatpush1.bf16.msra.mxu1 %v825_v1 }
   0x4   :  { %803 = vmatprep.subr.bf16.mxu1 %v828_v5 }
   0x6   :  { %736 = vmatmul.mubr.msk.bf16.vlgmr.msra.gmra.mxu0 %vm157_vm0, %v826_v3  ;;  %741 = vmatmul.mubr.msk.bf16.vlgmr.msra.gmra.mxu1 %vm157_vm0, %v827_v4 }
   0x7   :  { %218 = vmatprep.mubr.bf16.mxu0 %v855_v2  ;;  %804 = vmatpush3.bf16.msra.mxu1 %v828_v5 }
   0x8   :  { %805 = vmatprep.mubr.msk.bf16.mxu1 %vm157_vm0, %v826_v3 }
   0x9   :  { %9 = vsyncpa [#allocation4], 0  ;;  %v829_v6 = vld [vmem:[%s1016_s0 + $0x8] sm:$0xff]   ;;  %v830_v7 = vld [vmem:[%s1016_s0 + $0x10] sm:$0xff]   ;;  %v463_v10 = vlaneseq }
   0xa   :  { %v831_v8 = vld [vmem:[%s1016_s0 + $0x18] sm:$0xff]   ;;  %v832_v9 = vld [vmem:[%s1016_s0 + $0x20] sm:$0xff]  }
   0xb   :  { %v464_v11 = vshrl.u32 %v463_v10, 7  ;;  %v461_v13 = vld [vmem:[%s1018_s2] sm:$0x7]  ;;  %s856_s2 = smov [#allocation3]  }
   0xc   :  { %v514_v16 = vld [vmem:[%s1019_s3] sm:$0x7]  ;;  %s716_s3 = sshll.u32 %s856_s2, 4  ;;  %s717_s3 = int_to_ptr.vmem [resolvable:$true] %s716_s3 }
   0xd   :  { %v465_v12 = vsub.s32 0, %v464_v11  ;;  %v469_v14 = vsub.s32 1, %v464_v11  ;;  %v473_v21 = vsub.s32 2, %v464_v11  ;;  %s833_s9 = scalar_lea.vmem %s717_s3, 2304  ;;  %p838_p1 = scmp.lt.s32.totalorder %s717_s3, %s717_s3 }
   0xe   :  { %737 = vmatmul.mubr.msk.bf16.gmra.mxu0 %vm157_vm0, %v829_v6  ;;  %806 = vmatmul.mubr.msk.bf16.vlgmr.msra.gmra.mxu1 %vm157_vm0, %v829_v6  ;;  %p834_p0 = scmp.ne.s32.totalorder %s717_s3, %s833_s9  ;;  %p839_p2 = scmp.lt.s32.totalorder %s833_s9, %s833_s9 }
   0xf   :  { %228 = vmatprep.mubr.bf16.mxu0 %v855_v2  ;;  %809 = vmatprep.mubr.msk.bf16.mxu1 %vm157_vm0, %v830_v7  ;;  %v926_v15 = vrot.slane %v461_v13, %v465_v12  ;;  %v931_v17 = vrot.slane %v461_v13, %v469_v14  ;;  %v933_v19 = vrot.slane %v514_v16, %v465_v12 }
  0x10   :  { %v936_v23 = vrot.slane %v514_v16, %v469_v14  ;;  %v943_v33 = vrot.slane %v461_v13, %v473_v21  ;;  %v950_v43 = vrot.slane %v514_v16, %v473_v21  ;;  %p840_p3 = por %p839_p2, %p838_p1 }
  0x12   :  { %p841_p4 = pnand %p840_p3, %p834_p0 }
  0x16   :  { %738 = vmatmul.mubr.msk.bf16.gmra.mxu0 %vm157_vm0, %v830_v7  ;;  %810 = vmatmul.mubr.msk.bf16.gmra.mxu1 %vm157_vm0, %v831_v8 }
  0x17   :  { %238 = vmatprep.mubr.bf16.mxu0 %v855_v2  ;;  %813 = vmatprep.mubr.msk.bf16.mxu1 %vm157_vm0, %v832_v9 }
  0x1e   :  { %739 = vmatmul.mubr.msk.bf16.gmra.mxu0 %vm157_vm0, %v831_v8  ;;  %814 = vmatmul.mubr.msk.bf16.gmra.mxu1 %vm157_vm0, %v827_v4 }
  0x1f   :  { %248 = vmatprep.mubr.bf16.mxu0 %v855_v2 }
  0x26   :  { %740 = vmatmul.mubr.msk.bf16.gmra.mxu0 %vm157_vm0, %v832_v9 }
  0xc6   :  { %v210_v18 = vpop.f32.mrf.mxu0  ;;  %v260_v20 = vpop.f32.mrf.mxu1 }
  0xc7   :  { %v478_v22 = vmul.f32 %v926_v15, %v210_v18  ;;  %v508_v24 = vmul.f32 %v926_v15, %v260_v20 }
  0xc8   :  { %v212_v25 = vpop.f32.mrf.mxu0  ;;  %v262_v26 = vpop.f32.mrf.mxu1 }
  0xc9   :  { %v479_v27 = vmul.f32 %v931_v17, %v212_v25  ;;  %v561_v28 = vadd.f32 %v933_v19, %v508_v24  ;;  %v509_v29 = vmul.f32 %v931_v17, %v262_v26  ;;  %v531_v30 = vadd.f32 %v933_v19, %v478_v22 }
  0xca   :  { %v214_v31 = vpop.f32.mrf.mxu0  ;;  %v264_v32 = vpop.f32.mrf.mxu1 }
  0xcb   :  { %v532_v34 = vadd.f32 %v936_v23, %v479_v27  ;;  %v481_v35 = vmul.f32 %v926_v15, %v214_v31  ;;  %v562_v36 = vadd.f32 %v936_v23, %v509_v29  ;;  %v511_v37 = vmul.f32 %v926_v15, %v264_v32 }
  0xcc   :  { %v216_v38 = vpop.f32.mrf.mxu0  ;;  %v266_v39 = vpop.f32.mrf.mxu1 }
  0xcd   :  { %v772_v40 = vpack.c.bf16 %v532_v34, %v531_v30  ;;  %v792_v41 = vpack.c.bf16 %v562_v36, %v561_v28  ;;  %v482_v42 = vmul.f32 %v931_v17, %v216_v38  ;;  %v564_v44 = vadd.f32 %v933_v19, %v511_v37 }
  0xce   :  { %v220_v45 = vpop.f32.mrf.mxu0  ;;  %v512_v46 = vmul.f32 %v931_v17, %v266_v39  ;;  %v807_v47 = vpop.f32.mrf.mxu1  ;;  %v534_v48 = vadd.f32 %v933_v19, %v481_v35 }
  0xcf   :  { %687 = vst [vmem:[#allocation3] sm:$0xff] %v772_v40  ;;  %707 = vst [vmem:[#allocation3 + $0x78] sm:$0xff] %v792_v41  ;;  %v535_v49 = vadd.f32 %v936_v23, %v482_v42  ;;  %v484_v50 = vmul.f32 %v926_v15, %v220_v45  ;;  %v486_v51 = vmul.f32 %v807_v47, %v943_v33 }
  0xd0   :  { %v565_v52 = vadd.f32 %v936_v23, %v512_v46  ;;  %v222_v53 = vpop.f32.mrf.mxu0  ;;  %v303_v54 = vpop.f32.mrf.mxu1 }
  0xd1   :  { %v774_v55 = vpack.c.bf16 %v535_v49, %v534_v48  ;;  %v485_v56 = vmul.f32 %v931_v17, %v222_v53  ;;  %v539_v57 = vadd.f32 %v950_v43, %v486_v51  ;;  %v537_v58 = vadd.f32 %v933_v19, %v484_v50 }
  0xd2   :  { %v794_v59 = vpack.c.bf16 %v565_v52, %v564_v44  ;;  %v224_v60 = vpop.f32.mrf.mxu0  ;;  %v480_v61 = vmul.f32 %v943_v33, %v303_v54  ;;  %v808_v62 = vpop.f32.mrf.mxu1 }
  0xd3   :  { %689 = vst [vmem:[#allocation3 + $0xc] sm:$0xff] %v774_v55  ;;  %v538_v63 = vadd.f32 %v936_v23, %v485_v56  ;;  %v777_v0 = vpack.c.bf16 %v539_v57, %v539_v57  ;;  %v487_v1 = vmul.f32 %v926_v15, %v224_v60  ;;  %v489_v2 = vmul.f32 %v808_v62, %v943_v33 }
  0xd4   :  { %709 = vst [vmem:[#allocation3 + $0x84] sm:$0xff] %v794_v59  ;;  %v533_v3 = vadd.f32 %v950_v43, %v480_v61  ;;  %v226_v4 = vpop.f32.mrf.mxu0  ;;  %v306_v5 = vpop.f32.mrf.mxu1 }
  0xd5   :  { %v776_v6 = vpack.c.bf16 %v538_v63, %v537_v58  ;;  %692 = vst [vmem:[#allocation3 + $0x20] sm:$0xf] %v777_v0  ;;  %v488_v7 = vmul.f32 %v931_v17, %v226_v4  ;;  %v542_v8 = vadd.f32 %v950_v43, %v489_v2  ;;  %v540_v9 = vadd.f32 %v933_v19, %v487_v1 }
  0xd6   :  { %v773_v10 = vpack.c.bf16 %v533_v3, %v533_v3  ;;  %v230_v11 = vpop.f32.mrf.mxu0  ;;  %v483_v12 = vmul.f32 %v943_v33, %v306_v5  ;;  %v811_v13 = vpop.f32.mrf.mxu1 }
  0xd7   :  { %691 = vst [vmem:[#allocation3 + $0x18] sm:$0xff] %v776_v6  ;;  %v541_v14 = vadd.f32 %v936_v23, %v488_v7  ;;  %v779_v16 = vpack.c.bf16 %v542_v8, %v542_v8  ;;  %v490_v18 = vmul.f32 %v926_v15, %v230_v11  ;;  %v498_v20 = vmul.f32 %v811_v13, %v943_v33 }
  0xd8   :  { %688 = vst [vmem:[#allocation3 + $0x8] sm:$0xf] %v773_v10  ;;  %v536_v21 = vadd.f32 %v950_v43, %v483_v12  ;;  %v232_v22 = vpop.f32.mrf.mxu0  ;;  %v319_v24 = vpop.f32.mrf.mxu1 }
  0xd9   :  { %v778_v25 = vpack.c.bf16 %v541_v14, %v540_v9  ;;  %694 = vst [vmem:[#allocation3 + $0x2c] sm:$0xf] %v779_v16  ;;  %v491_v26 = vmul.f32 %v931_v17, %v232_v22  ;;  %v551_v27 = vadd.f32 %v950_v43, %v498_v20  ;;  %v543_v28 = vadd.f32 %v933_v19, %v490_v18 }
  0xda   :  { %v775_v29 = vpack.c.bf16 %v536_v21, %v536_v21  ;;  %v234_v30 = vpop.f32.mrf.mxu0  ;;  %v492_v31 = vmul.f32 %v943_v33, %v319_v24  ;;  %v812_v32 = vpop.f32.mrf.mxu1 }
  0xdb   :  { %693 = vst [vmem:[#allocation3 + $0x24] sm:$0xff] %v778_v25  ;;  %v544_v34 = vadd.f32 %v936_v23, %v491_v26  ;;  %v785_v35 = vpack.c.bf16 %v551_v27, %v551_v27  ;;  %v493_v36 = vmul.f32 %v926_v15, %v234_v30  ;;  %v501_v37 = vmul.f32 %v812_v32, %v943_v33 }
  0xdc   :  { %690 = vst [vmem:[#allocation3 + $0x14] sm:$0xf] %v775_v29  ;;  %v545_v38 = vadd.f32 %v950_v43, %v492_v31  ;;  %v236_v39 = vpop.f32.mrf.mxu0  ;;  %v322_v40 = vpop.f32.mrf.mxu1 }
  0xdd   :  { %v780_v41 = vpack.c.bf16 %v544_v34, %v543_v28  ;;  %700 = vst [vmem:[#allocation3 + $0x50] sm:$0xf] %v785_v35  ;;  %v494_v42 = vmul.f32 %v931_v17, %v236_v39  ;;  %v554_v44 = vadd.f32 %v950_v43, %v501_v37  ;;  %v546_v45 = vadd.f32 %v933_v19, %v493_v36 }
  0xde   :  { %v781_v46 = vpack.c.bf16 %v545_v38, %v545_v38  ;;  %v240_v47 = vpop.f32.mrf.mxu0  ;;  %v495_v48 = vmul.f32 %v943_v33, %v322_v40  ;;  %v815_v49 = vpop.f32.mrf.mxu1 }
  0xdf   :  { %695 = vst [vmem:[#allocation3 + $0x30] sm:$0xff] %v780_v41  ;;  %v547_v50 = vadd.f32 %v936_v23, %v494_v42  ;;  %v787_v51 = vpack.c.bf16 %v554_v44, %v554_v44  ;;  %v496_v52 = vmul.f32 %v926_v15, %v240_v47  ;;  %v510_v53 = vmul.f32 %v815_v49, %v943_v33 }
  0xe0   :  { %696 = vst [vmem:[#allocation3 + $0x38] sm:$0xf] %v781_v46  ;;  %v548_v54 = vadd.f32 %v950_v43, %v495_v48  ;;  %v242_v55 = vpop.f32.mrf.mxu0  ;;  %v335_v56 = vpop.f32.mrf.mxu1 }
  0xe1   :  { %v782_v57 = vpack.c.bf16 %v547_v50, %v546_v45  ;;  %702 = vst [vmem:[#allocation3 + $0x5c] sm:$0xf] %v787_v51  ;;  %v497_v58 = vmul.f32 %v931_v17, %v242_v55  ;;  %v563_v59 = vadd.f32 %v950_v43, %v510_v53  ;;  %v549_v60 = vadd.f32 %v933_v19, %v496_v52 }
  0xe2   :  { %v783_v61 = vpack.c.bf16 %v548_v54, %v548_v54  ;;  %v244_v62 = vpop.f32.mrf.mxu0  ;;  %v504_v63 = vmul.f32 %v943_v33, %v335_v56  ;;  %v816_v0 = vpop.f32.mrf.mxu1 }
  0xe3   :  { %697 = vst [vmem:[#allocation3 + $0x3c] sm:$0xff] %v782_v57  ;;  %v550_v1 = vadd.f32 %v936_v23, %v497_v58  ;;  %v793_v2 = vpack.c.bf16 %v563_v59, %v563_v59  ;;  %v499_v3 = vmul.f32 %v926_v15, %v244_v62  ;;  %v513_v4 = vmul.f32 %v816_v0, %v943_v33 }
  0xe4   :  { %698 = vst [vmem:[#allocation3 + $0x44] sm:$0xf] %v783_v61  ;;  %v557_v5 = vadd.f32 %v950_v43, %v504_v63  ;;  %v246_v6 = vpop.f32.mrf.mxu0  ;;  %v338_v7 = vpop.f32.mrf.mxu1 }
  0xe5   :  { %v784_v8 = vpack.c.bf16 %v550_v1, %v549_v60  ;;  %708 = vst [vmem:[#allocation3 + $0x80] sm:$0xf] %v793_v2  ;;  %v500_v9 = vmul.f32 %v931_v17, %v246_v6  ;;  %v566_v10 = vadd.f32 %v950_v43, %v513_v4  ;;  %v507_v13 = vmul.f32 %v943_v33, %v338_v7 }
  0xe6   :  { %v789_v11 = vpack.c.bf16 %v557_v5, %v557_v5  ;;  %v250_v12 = vpop.f32.mrf.mxu0  ;;  %v552_v14 = vadd.f32 %v933_v19, %v499_v3 }
  0xe7   :  { %699 = vst [vmem:[#allocation3 + $0x48] sm:$0xff] %v784_v8  ;;  %v553_v16 = vadd.f32 %v936_v23, %v500_v9  ;;  %v795_v18 = vpack.c.bf16 %v566_v10, %v566_v10  ;;  %v502_v20 = vmul.f32 %v926_v15, %v250_v12  ;;  %v560_v21 = vadd.f32 %v950_v43, %v507_v13 }
  0xe8   :  { %704 = vst [vmem:[#allocation3 + $0x68] sm:$0xf] %v789_v11  ;;  %v252_v22 = vpop.f32.mrf.mxu0 }
  0xe9   :  { %v786_v24 = vpack.c.bf16 %v553_v16, %v552_v14  ;;  %710 = vst [vmem:[#allocation3 + $0x8c] sm:$0xf] %v795_v18  ;;  %v503_v25 = vmul.f32 %v931_v17, %v252_v22  ;;  %v791_v26 = vpack.c.bf16 %v560_v21, %v560_v21  ;;  %v555_v33 = vadd.f32 %v933_v19, %v502_v20 }
  0xea   :  { %v254_v27 = vpop.f32.mrf.mxu0 }
  0xeb   :  { %701 = vst [vmem:[#allocation3 + $0x54] sm:$0xff] %v786_v24  ;;  %v556_v28 = vadd.f32 %v936_v23, %v503_v25  ;;  %v505_v29 = vmul.f32 %v926_v15, %v254_v27  ;;  %706 = vst [vmem:[#allocation3 + $0x74] sm:$0xf] %v791_v26 }
  0xec   :  { %v256_v30 = vpop.f32.mrf.mxu0 }
  0xed   :  { %v788_v31 = vpack.c.bf16 %v556_v28, %v555_v33  ;;  %v506_v32 = vmul.f32 %v931_v17, %v256_v30  ;;  %v558_v43 = vadd.f32 %v933_v19, %v505_v29 }
  0xef   :  { %703 = vst [vmem:[#allocation3 + $0x60] sm:$0xff] %v788_v31  ;;  %v559_v34 = vadd.f32 %v936_v23, %v506_v32 }
  0xf1   :  { %v790_v35 = vpack.c.bf16 %v559_v34, %v558_v43 }
  0xf3   :  { %705 = vst [vmem:[#allocation3 + $0x6c] sm:$0xff] %v790_v35 }
  0xf4   :  { %844 = shalt.err (!%p841_p4)
}
  0xf5   :  { %s857_s10 = smov 192   ;;  %s858_s11 = smov 12  }
  0xf6   :  { %722 = dma.vmem_to_hbm [thread:$0]  %s717_s3, 2304, %s1020_s4, [#allocation4], %s857_s10, %s857_s10, %s858_s11  }
  0xf7   :  { %853 = dma.done.wait [#allocation4], 2304  }
  0xf8   :  { %854 = vsyncadd [#allocation4], 4294964992 }
  0xf9   :  { %726 = vsyncpa [#allocation4], 1 }

</bundles_post_ra>
